<compile_context>
chip_gen: v6e
topology: v6e:2x2x1
jax: 0.10.0
libtpu: 0.0.40
codegen_flags: <defaults>
</compile_context>

<pallas_src>
import functools

import jax
import jax.numpy as jnp
from jax.experimental import pallas as pl
from jax.experimental.pallas import tpu as pltpu

LANE = 128  # TPU lane width


def _round_up(n, m):
    return ((n + m - 1) // m) * m


# ----------------------------- Pallas kernel -------------------------------- #
def _vae_kernel(
    x_ref, eps_ref,
    w_e1_ref, b_e1_ref, w_e2_ref, b_e2_ref,
    w_head_ref, b_head_ref,
    w_d1_ref, b_d1_ref, w_d2_ref, b_d2_ref,
    w_f_ref, b_f_ref,
    out_ref,
):
    x = x_ref[...]  # (TILE_B, 128), already f32, already lane-padded with zeros

    # ---- encoder: DNNSetMatching (Linear -> ReLU stack) ----
    h = jnp.dot(x, w_e1_ref[...], preferred_element_type=jnp.float32) + b_e1_ref[...]
    h = jnp.maximum(h, 0.0)
    h = jnp.dot(h, w_e2_ref[...], preferred_element_type=jnp.float32) + b_e2_ref[...]
    h = jnp.maximum(h, 0.0)

    # ---- fused latent heads: one matmul, mu in lanes [0,128), logvar in [128,256) ----
    head = jnp.dot(h, w_head_ref[...], preferred_element_type=jnp.float32) + b_head_ref[...]
    z_mean = head[:, :LANE]        # lane-aligned static slice
    z_logvar = head[:, LANE:]      # lane-aligned static slice

    # ---- reparameterise: z = mean + exp(0.5*logvar) * eps ----
    z_std = jnp.exp(0.5 * z_logvar)          # EUP slot
    z = z_mean + z_std * eps_ref[...]        # eps is zero in pad lanes -> z pad lanes == 0

    # ---- decoder: DNNSetMatching over reversed fc_units ----
    d = jnp.dot(z, w_d1_ref[...], preferred_element_type=jnp.float32) + b_d1_ref[...]
    d = jnp.maximum(d, 0.0)
    d = jnp.dot(d, w_d2_ref[...], preferred_element_type=jnp.float32) + b_d2_ref[...]
    d = jnp.maximum(d, 0.0)

    # ---- final projection back to input_size (padded to 128) ----
    x_recon = jnp.dot(d, w_f_ref[...], preferred_element_type=jnp.float32) + b_f_ref[...]

    # ---- single lane-dense output slab: [x_recon | z | z_mean | z_std] ----
    out_ref[:, 0 * LANE:1 * LANE] = x_recon
    out_ref[:, 1 * LANE:2 * LANE] = z
    out_ref[:, 2 * LANE:3 * LANE] = z_mean
    out_ref[:, 3 * LANE:4 * LANE] = z_std


# ------------------------------ Wrapper -------------------------------------- #
@functools.partial(jax.jit, static_argnames=("input_size", "latent_dim", "tile_b"))
def vae_forward(x, eps, params, *, input_size, latent_dim, tile_b=32):
    """Fused VAE forward. Returns (x_recon, z, (q_mean, q_std), (p_mean, p_std))."""
    B = x.shape[0]

    # Pad batch to a multiple of tile_b and features to 128 lanes (zero pad).
    Bp = _round_up(max(B, 8), tile_b)
    xp = jnp.zeros((Bp, LANE), jnp.float32).at[:B, :input_size].set(x)
    epsp = jnp.zeros((Bp, LANE), jnp.float32).at[:B, :latent_dim].set(eps)
    nb = Bp // tile_b

    operands = (
        xp, epsp,
        params["w_e1"], params["b_e1"], params["w_e2"], params["b_e2"],
        params["w_head"], params["b_head"],
        params["w_d1"], params["b_d1"], params["w_d2"], params["b_d2"],
        params["w_f"], params["b_f"],
    )

    def batch_spec(feat):
        return pl.BlockSpec((tile_b, feat), lambda i: (i, 0))

    def resident_spec(shape):
        # Weights/biases: constant block index -> DMA'd once, VMEM-resident.
        return pl.BlockSpec(shape, lambda i: (0, 0))

    in_specs = [
        batch_spec(LANE),                      # x
        batch_spec(LANE),                      # eps
        resident_spec((LANE, LANE)),           # w_e1
        resident_spec((1, LANE)),              # b_e1
        resident_spec((LANE, LANE)),           # w_e2
        resident_spec((1, LANE)),              # b_e2
        resident_spec((LANE, 2 * LANE)),       # w_head (mu | logvar)
        resident_spec((1, 2 * LANE)),          # b_head
        resident_spec((LANE, LANE)),           # w_d1
        resident_spec((1, LANE)),              # b_d1
        resident_spec((LANE, LANE)),           # w_d2
        resident_spec((1, LANE)),              # b_d2
        resident_spec((LANE, LANE)),           # w_f
        resident_spec((1, LANE)),              # b_f
    ]

    out = pl.pallas_call(
        _vae_kernel,
        out_shape=jax.ShapeDtypeStruct((Bp, 4 * LANE), jnp.float32),
        grid=(nb,),
        in_specs=in_specs,
        out_specs=pl.BlockSpec((tile_b, 4 * LANE), lambda i: (i, 0)),
        compiler_params=pltpu.CompilerParams(
            dimension_semantics=("parallel",),  # megacore sharding on v7x
        ),
    )(*operands)

    # Slice the fused lane-dense slab apart (layout plumbing, done by XLA).
    x_recon = out[:B, 0 * LANE:0 * LANE + input_size]
    z = out[:B, 1 * LANE:1 * LANE + latent_dim]
    z_mean = out[:B, 2 * LANE:2 * LANE + latent_dim]
    z_std = out[:B, 3 * LANE:3 * LANE + latent_dim]

    # Prior distribution parameters (Normal(loc, scale) broadcast to z shape).
    p_mean = jnp.full_like(z_mean, params["prior_loc"])
    p_std = jnp.full_like(z_std, params["prior_scale"])

    return x_recon, z, (z_mean, z_std), (p_mean, p_std)


# --------------------------- Parameter init ---------------------------------- #
def init_params(key, input_size, fc_units, latent_dim):
    """PyTorch-Linear-style init; returns (padded kernel params, raw params)."""
    def linear(k, fan_in, fan_out):
        k_w, k_b = jax.random.split(k)
        lim = 1.0 / jnp.sqrt(jnp.float32(fan_in))
        w = jax.random.uniform(k_w, (fan_in, fan_out), jnp.float32, -lim, lim)
        b = jax.random.uniform(k_b, (fan_out,), jnp.float32, -lim, lim)
        return w, b

    def pad_wb(w, b, rows_p, cols_p):
        wp = jnp.zeros((rows_p, cols_p), jnp.float32).at[: w.shape[0], : w.shape[1]].set(w)
        bp = jnp.zeros((1, cols_p), jnp.float32).at[0, : b.shape[0]].set(b)
        return wp, bp

    keys = jax.random.split(key, 7)
    h0, h1 = fc_units
    rh0, rh1 = fc_units[::-1]

    w_e1, b_e1 = linear(keys[0], input_size, h0)
    w_e2, b_e2 = linear(keys[1], h0, h1)
    w_mu, b_mu = linear(keys[2], h1, latent_dim)
    w_lv, b_lv = linear(keys[3], h1, latent_dim)
    w_d1, b_d1 = linear(keys[4], latent_dim, rh0)
    w_d2, b_d2 = linear(keys[5], rh0, rh1)
    w_f, b_f = linear(keys[6], rh1, input_size)

    w_e1p, b_e1p = pad_wb(w_e1, b_e1, LANE, LANE)
    w_e2p, b_e2p = pad_wb(w_e2, b_e2, LANE, LANE)
    w_d1p, b_d1p = pad_wb(w_d1, b_d1, LANE, LANE)
    w_d2p, b_d2p = pad_wb(w_d2, b_d2, LANE, LANE)
    w_fp, b_fp = pad_wb(w_f, b_f, LANE, LANE)

    # Fused latent heads: one (128, 256) weight, mu in lanes [0,128), logvar in [128,256).
    w_head = jnp.zeros((LANE, 2 * LANE), jnp.float32)
    w_head = w_head.at[:h1, :latent_dim].set(w_mu)
    w_head = w_head.at[:h1, LANE:LANE + latent_dim].set(w_lv)
    b_head = jnp.zeros((1, 2 * LANE), jnp.float32)
    b_head = b_head.at[0, :latent_dim].set(b_mu)
    b_head = b_head.at[0, LANE:LANE + latent_dim].set(b_lv)

    padded = dict(
        w_e1=w_e1p, b_e1=b_e1p, w_e2=w_e2p, b_e2=b_e2p,
        w_head=w_head, b_head=b_head,
        w_d1=w_d1p, b_d1=b_d1p, w_d2=w_d2p, b_d2=b_d2p,
        w_f=w_fp, b_f=b_fp,
        prior_loc=0.0, prior_scale=1.0,
    )
    raw = dict(
        w_e1=w_e1, b_e1=b_e1, w_e2=w_e2, b_e2=b_e2,
        w_mu=w_mu, b_mu=b_mu, w_lv=w_lv, b_lv=b_lv,
        w_d1=w_d1, b_d1=b_d1, w_d2=w_d2, b_d2=b_d2,
        w_f=w_f, b_f=b_f,
    )
    return padded, raw


def _vae_reference(x, eps, raw):
    """Pure-JAX reference of the same forward pass (unpadded)."""
    h = jnp.maximum(x @ raw["w_e1"] + raw["b_e1"], 0.0)
    h = jnp.maximum(h @ raw["w_e2"] + raw["b_e2"], 0.0)
    z_mean = h @ raw["w_mu"] + raw["b_mu"]
    z_logvar = h @ raw["w_lv"] + raw["b_lv"]
    z_std = jnp.exp(0.5 * z_logvar)
    z = z_mean + z_std * eps
    d = jnp.maximum(z @ raw["w_d1"] + raw["b_d1"], 0.0)
    d = jnp.maximum(d @ raw["w_d2"] + raw["b_d2"], 0.0)
    x_recon = d @ raw["w_f"] + raw["b_f"]
    return x_recon, z, z_mean, z_std


# ------------------------------- Main ----------------------------------------- #
if __name__ == "__main__":
    # params = {'input_size': 16, 'fc_units': [32, 32], 'latent_size': 8,
    #           'prior_params': {'loc': 0.0, 'scale': 1.0}}
    B = 64
    INPUT_SIZE = 16
    FC_UNITS = [32, 32]
    LATENT = 8
    TILE_B = 32

    key = jax.random.PRNGKey(0)
    k_par, k_x, k_eps = jax.random.split(key, 3)

    params, raw = init_params(k_par, INPUT_SIZE, FC_UNITS, LATENT)
    x = jax.random.normal(k_x, (B, INPUT_SIZE), jnp.float32)
    eps = jax.random.normal(k_eps, (B, LATENT), jnp.float32)  # rsample noise

    x_recon, z, (q_mean, q_std), (p_mean, p_std) = vae_forward(
        x, eps, params, input_size=INPUT_SIZE, latent_dim=LATENT, tile_b=TILE_B
    )
    jax.block_until_ready((x_recon, z, q_mean, q_std, p_mean, p_std))

    assert x_recon.shape == (B, INPUT_SIZE)
    assert z.shape == (B, LATENT)
    assert q_mean.shape == (B, LATENT) and q_std.shape == (B, LATENT)
    assert p_mean.shape == (B, LATENT) and p_std.shape == (B, LATENT)

    # Numerical check against a pure-JAX reference.
    r_xrec, r_z, r_mean, r_std = _vae_reference(x, eps, raw)
    for got, want in ((x_recon, r_xrec), (z, r_z), (q_mean, r_mean), (q_std, r_std)):
        if not jnp.allclose(got, want, rtol=1e-4, atol=1e-4):
            raise AssertionError("Pallas VAE kernel mismatch vs JAX reference")

    print("KERNEL_OK")
</pallas_src>

<mosaic_0001>
module attributes {stable_mosaic.version = 11 : i64} {
  func.func @_vae_kernel(%arg0: i32, %arg1: memref<32x128xf32, #tpu.memory_space<vmem>>, %arg2: memref<32x128xf32, #tpu.memory_space<vmem>>, %arg3: memref<128x128xf32, #tpu.memory_space<vmem>>, %arg4: memref<1x128xf32, #tpu.memory_space<vmem>>, %arg5: memref<128x128xf32, #tpu.memory_space<vmem>>, %arg6: memref<1x128xf32, #tpu.memory_space<vmem>>, %arg7: memref<128x256xf32, #tpu.memory_space<vmem>>, %arg8: memref<1x256xf32, #tpu.memory_space<vmem>>, %arg9: memref<128x128xf32, #tpu.memory_space<vmem>>, %arg10: memref<1x128xf32, #tpu.memory_space<vmem>>, %arg11: memref<128x128xf32, #tpu.memory_space<vmem>>, %arg12: memref<1x128xf32, #tpu.memory_space<vmem>>, %arg13: memref<128x128xf32, #tpu.memory_space<vmem>>, %arg14: memref<1x128xf32, #tpu.memory_space<vmem>>, %arg15: memref<32x512xf32, #tpu.memory_space<vmem>>) attributes {dimension_semantics = [#tpu.dimension_semantics<parallel>], iteration_bounds = array<i64: 2>, scalar_prefetch = 0 : i64, scratch_operands = 0 : i64, tpu.core_type = #tpu.core_type<tc>, window_params = [{transform_indices = @transform_0, window_bounds = array<i64: 32, 128>}, {transform_indices = @transform_1, window_bounds = array<i64: 32, 128>}, {pipeline_mode = #tpu.pipeline_mode<synchronous>, transform_indices = @transform_2, window_bounds = array<i64: 128, 128>}, {pipeline_mode = #tpu.pipeline_mode<synchronous>, transform_indices = @transform_3, window_bounds = array<i64: 1, 128>}, {pipeline_mode = #tpu.pipeline_mode<synchronous>, transform_indices = @transform_4, window_bounds = array<i64: 128, 128>}, {pipeline_mode = #tpu.pipeline_mode<synchronous>, transform_indices = @transform_5, window_bounds = array<i64: 1, 128>}, {pipeline_mode = #tpu.pipeline_mode<synchronous>, transform_indices = @transform_6, window_bounds = array<i64: 128, 256>}, {pipeline_mode = #tpu.pipeline_mode<synchronous>, transform_indices = @transform_7, window_bounds = array<i64: 1, 256>}, {pipeline_mode = #tpu.pipeline_mode<synchronous>, transform_indices = @transform_8, window_bounds = array<i64: 128, 128>}, {pipeline_mode = #tpu.pipeline_mode<synchronous>, transform_indices = @transform_9, window_bounds = array<i64: 1, 128>}, {pipeline_mode = #tpu.pipeline_mode<synchronous>, transform_indices = @transform_10, window_bounds = array<i64: 128, 128>}, {pipeline_mode = #tpu.pipeline_mode<synchronous>, transform_indices = @transform_11, window_bounds = array<i64: 1, 128>}, {pipeline_mode = #tpu.pipeline_mode<synchronous>, transform_indices = @transform_12, window_bounds = array<i64: 128, 128>}, {pipeline_mode = #tpu.pipeline_mode<synchronous>, transform_indices = @transform_13, window_bounds = array<i64: 1, 128>}, {transform_indices = @transform_14, window_bounds = array<i64: 32, 512>}]} {
    %c0 = arith.constant 0 : index
    %c0_0 = arith.constant 0 : index
    %0 = vector.load %arg1[%c0, %c0_0] : memref<32x128xf32, #tpu.memory_space<vmem>>, vector<32x128xf32>
    %c0_1 = arith.constant 0 : index
    %c0_2 = arith.constant 0 : index
    %1 = vector.load %arg3[%c0_1, %c0_2] : memref<128x128xf32, #tpu.memory_space<vmem>>, vector<128x128xf32>
    %cst = arith.constant dense<0.000000e+00> : vector<32x128xf32>
    %2 = tpu.matmul %0, %1, %cst {dimension_numbers = #tpu.dot_dimension_numbers<[1], [0], [0], [1], [0, 0, 1, 1], [], []>} : vector<32x128xf32>, vector<128x128xf32>, vector<32x128xf32> -> vector<32x128xf32>
    %c0_3 = arith.constant 0 : index
    %c0_4 = arith.constant 0 : index
    %3 = vector.load %arg4[%c0_3, %c0_4] : memref<1x128xf32, #tpu.memory_space<vmem>>, vector<1x128xf32>
    %4 = vector.broadcast %3 : vector<1x128xf32> to vector<32x128xf32>
    %5 = arith.addf %2, %4 : vector<32x128xf32>
    %cst_5 = arith.constant 0.000000e+00 : f32
    %6 = vector.broadcast %cst_5 : f32 to vector<32x128xf32>
    %7 = arith.maximumf %5, %6 : vector<32x128xf32>
    %c0_6 = arith.constant 0 : index
    %c0_7 = arith.constant 0 : index
    %8 = vector.load %arg5[%c0_6, %c0_7] : memref<128x128xf32, #tpu.memory_space<vmem>>, vector<128x128xf32>
    %cst_8 = arith.constant dense<0.000000e+00> : vector<32x128xf32>
    %9 = tpu.matmul %7, %8, %cst_8 {dimension_numbers = #tpu.dot_dimension_numbers<[1], [0], [0], [1], [0, 0, 1, 1], [], []>} : vector<32x128xf32>, vector<128x128xf32>, vector<32x128xf32> -> vector<32x128xf32>
    %c0_9 = arith.constant 0 : index
    %c0_10 = arith.constant 0 : index
    %10 = vector.load %arg6[%c0_9, %c0_10] : memref<1x128xf32, #tpu.memory_space<vmem>>, vector<1x128xf32>
    %11 = vector.broadcast %10 : vector<1x128xf32> to vector<32x128xf32>
    %12 = arith.addf %9, %11 : vector<32x128xf32>
    %cst_11 = arith.constant 0.000000e+00 : f32
    %13 = vector.broadcast %cst_11 : f32 to vector<32x128xf32>
    %14 = arith.maximumf %12, %13 : vector<32x128xf32>
    %c0_12 = arith.constant 0 : index
    %c0_13 = arith.constant 0 : index
    %15 = vector.load %arg7[%c0_12, %c0_13] : memref<128x256xf32, #tpu.memory_space<vmem>>, vector<128x256xf32>
    %cst_14 = arith.constant dense<0.000000e+00> : vector<32x256xf32>
    %16 = tpu.matmul %14, %15, %cst_14 {dimension_numbers = #tpu.dot_dimension_numbers<[1], [0], [0], [1], [0, 0, 1, 1], [], []>} : vector<32x128xf32>, vector<128x256xf32>, vector<32x256xf32> -> vector<32x256xf32>
    %c0_15 = arith.constant 0 : index
    %c0_16 = arith.constant 0 : index
    %17 = vector.load %arg8[%c0_15, %c0_16] : memref<1x256xf32, #tpu.memory_space<vmem>>, vector<1x256xf32>
    %18 = vector.broadcast %17 : vector<1x256xf32> to vector<32x256xf32>
    %19 = arith.addf %16, %18 : vector<32x256xf32>
    %20 = vector.extract_strided_slice %19 {offsets = [0, 0], sizes = [32, 128], strides = [1, 1]} : vector<32x256xf32> to vector<32x128xf32>
    %21 = vector.extract_strided_slice %19 {offsets = [0, 128], sizes = [32, 128], strides = [1, 1]} : vector<32x256xf32> to vector<32x128xf32>
    %cst_17 = arith.constant 5.000000e-01 : f32
    %22 = vector.broadcast %cst_17 : f32 to vector<32x128xf32>
    %23 = arith.mulf %22, %21 : vector<32x128xf32>
    %24 = math.exp %23 : vector<32x128xf32>
    %c0_18 = arith.constant 0 : index
    %c0_19 = arith.constant 0 : index
    %25 = vector.load %arg2[%c0_18, %c0_19] : memref<32x128xf32, #tpu.memory_space<vmem>>, vector<32x128xf32>
    %26 = arith.mulf %24, %25 : vector<32x128xf32>
    %27 = arith.addf %20, %26 : vector<32x128xf32>
    %c0_20 = arith.constant 0 : index
    %c0_21 = arith.constant 0 : index
    %28 = vector.load %arg9[%c0_20, %c0_21] : memref<128x128xf32, #tpu.memory_space<vmem>>, vector<128x128xf32>
    %cst_22 = arith.constant dense<0.000000e+00> : vector<32x128xf32>
    %29 = tpu.matmul %27, %28, %cst_22 {dimension_numbers = #tpu.dot_dimension_numbers<[1], [0], [0], [1], [0, 0, 1, 1], [], []>} : vector<32x128xf32>, vector<128x128xf32>, vector<32x128xf32> -> vector<32x128xf32>
    %c0_23 = arith.constant 0 : index
    %c0_24 = arith.constant 0 : index
    %30 = vector.load %arg10[%c0_23, %c0_24] : memref<1x128xf32, #tpu.memory_space<vmem>>, vector<1x128xf32>
    %31 = vector.broadcast %30 : vector<1x128xf32> to vector<32x128xf32>
    %32 = arith.addf %29, %31 : vector<32x128xf32>
    %cst_25 = arith.constant 0.000000e+00 : f32
    %33 = vector.broadcast %cst_25 : f32 to vector<32x128xf32>
    %34 = arith.maximumf %32, %33 : vector<32x128xf32>
    %c0_26 = arith.constant 0 : index
    %c0_27 = arith.constant 0 : index
    %35 = vector.load %arg11[%c0_26, %c0_27] : memref<128x128xf32, #tpu.memory_space<vmem>>, vector<128x128xf32>
    %cst_28 = arith.constant dense<0.000000e+00> : vector<32x128xf32>
    %36 = tpu.matmul %34, %35, %cst_28 {dimension_numbers = #tpu.dot_dimension_numbers<[1], [0], [0], [1], [0, 0, 1, 1], [], []>} : vector<32x128xf32>, vector<128x128xf32>, vector<32x128xf32> -> vector<32x128xf32>
    %c0_29 = arith.constant 0 : index
    %c0_30 = arith.constant 0 : index
    %37 = vector.load %arg12[%c0_29, %c0_30] : memref<1x128xf32, #tpu.memory_space<vmem>>, vector<1x128xf32>
    %38 = vector.broadcast %37 : vector<1x128xf32> to vector<32x128xf32>
    %39 = arith.addf %36, %38 : vector<32x128xf32>
    %cst_31 = arith.constant 0.000000e+00 : f32
    %40 = vector.broadcast %cst_31 : f32 to vector<32x128xf32>
    %41 = arith.maximumf %39, %40 : vector<32x128xf32>
    %c0_32 = arith.constant 0 : index
    %c0_33 = arith.constant 0 : index
    %42 = vector.load %arg13[%c0_32, %c0_33] : memref<128x128xf32, #tpu.memory_space<vmem>>, vector<128x128xf32>
    %cst_34 = arith.constant dense<0.000000e+00> : vector<32x128xf32>
    %43 = tpu.matmul %41, %42, %cst_34 {dimension_numbers = #tpu.dot_dimension_numbers<[1], [0], [0], [1], [0, 0, 1, 1], [], []>} : vector<32x128xf32>, vector<128x128xf32>, vector<32x128xf32> -> vector<32x128xf32>
    %c0_35 = arith.constant 0 : index
    %c0_36 = arith.constant 0 : index
    %44 = vector.load %arg14[%c0_35, %c0_36] : memref<1x128xf32, #tpu.memory_space<vmem>>, vector<1x128xf32>
    %45 = vector.broadcast %44 : vector<1x128xf32> to vector<32x128xf32>
    %46 = arith.addf %43, %45 : vector<32x128xf32>
    %c0_37 = arith.constant 0 : index
    %c0_38 = arith.constant 0 : index
    %47 = vector.load %arg15[%c0_37, %c0_38] : memref<32x512xf32, #tpu.memory_space<vmem>>, vector<32x128xf32>
    tpu.vector_store %arg15[%c0_37, %c0_38], %46 {strides = array<i32>} : memref<32x512xf32, #tpu.memory_space<vmem>>, vector<32x128xf32>,
    %c0_39 = arith.constant 0 : index
    %c128 = arith.constant 128 : index
    %48 = vector.load %arg15[%c0_39, %c128] : memref<32x512xf32, #tpu.memory_space<vmem>>, vector<32x128xf32>
    tpu.vector_store %arg15[%c0_39, %c128], %27 {strides = array<i32>} : memref<32x512xf32, #tpu.memory_space<vmem>>, vector<32x128xf32>,
    %c0_40 = arith.constant 0 : index
    %c256 = arith.constant 256 : index
    %49 = vector.load %arg15[%c0_40, %c256] : memref<32x512xf32, #tpu.memory_space<vmem>>, vector<32x128xf32>
    tpu.vector_store %arg15[%c0_40, %c256], %20 {strides = array<i32>} : memref<32x512xf32, #tpu.memory_space<vmem>>, vector<32x128xf32>,
    %c0_41 = arith.constant 0 : index
    %c384 = arith.constant 384 : index
    %50 = vector.load %arg15[%c0_41, %c384] : memref<32x512xf32, #tpu.memory_space<vmem>>, vector<32x128xf32>
    tpu.vector_store %arg15[%c0_41, %c384], %24 {strides = array<i32>} : memref<32x512xf32, #tpu.memory_space<vmem>>, vector<32x128xf32>,
    return
  }
  func.func @transform_0(%arg0: i32) -> (i32, i32) {
    %c0_i32 = arith.constant 0 : i32
    %c0_i32_0 = arith.constant 0 : i32
    return %arg0, %c0_i32 : i32, i32
  }
  func.func @transform_1(%arg0: i32) -> (i32, i32) {
    %c0_i32 = arith.constant 0 : i32
    %c0_i32_0 = arith.constant 0 : i32
    return %arg0, %c0_i32 : i32, i32
  }
  func.func @transform_2(%arg0: i32) -> (i32, i32) {
    %c0_i32 = arith.constant 0 : i32
    %c0_i32_0 = arith.constant 0 : i32
    %c0_i32_1 = arith.constant 0 : i32
    return %c0_i32, %c0_i32_0 : i32, i32
  }
  func.func @transform_3(%arg0: i32) -> (i32, i32) {
    %c0_i32 = arith.constant 0 : i32
    %c0_i32_0 = arith.constant 0 : i32
    %c0_i32_1 = arith.constant 0 : i32
    return %c0_i32, %c0_i32_0 : i32, i32
  }
  func.func @transform_4(%arg0: i32) -> (i32, i32) {
    %c0_i32 = arith.constant 0 : i32
    %c0_i32_0 = arith.constant 0 : i32
    %c0_i32_1 = arith.constant 0 : i32
    return %c0_i32, %c0_i32_0 : i32, i32
  }
  func.func @transform_5(%arg0: i32) -> (i32, i32) {
    %c0_i32 = arith.constant 0 : i32
    %c0_i32_0 = arith.constant 0 : i32
    %c0_i32_1 = arith.constant 0 : i32
    return %c0_i32, %c0_i32_0 : i32, i32
  }
  func.func @transform_6(%arg0: i32) -> (i32, i32) {
    %c0_i32 = arith.constant 0 : i32
    %c0_i32_0 = arith.constant 0 : i32
    %c0_i32_1 = arith.constant 0 : i32
    return %c0_i32, %c0_i32_0 : i32, i32
  }
  func.func @transform_7(%arg0: i32) -> (i32, i32) {
    %c0_i32 = arith.constant 0 : i32
    %c0_i32_0 = arith.constant 0 : i32
    %c0_i32_1 = arith.constant 0 : i32
    return %c0_i32, %c0_i32_0 : i32, i32
  }
  func.func @transform_8(%arg0: i32) -> (i32, i32) {
    %c0_i32 = arith.constant 0 : i32
    %c0_i32_0 = arith.constant 0 : i32
    %c0_i32_1 = arith.constant 0 : i32
    return %c0_i32, %c0_i32_0 : i32, i32
  }
  func.func @transform_9(%arg0: i32) -> (i32, i32) {
    %c0_i32 = arith.constant 0 : i32
    %c0_i32_0 = arith.constant 0 : i32
    %c0_i32_1 = arith.constant 0 : i32
    return %c0_i32, %c0_i32_0 : i32, i32
  }
  func.func @transform_10(%arg0: i32) -> (i32, i32) {
    %c0_i32 = arith.constant 0 : i32
    %c0_i32_0 = arith.constant 0 : i32
    %c0_i32_1 = arith.constant 0 : i32
    return %c0_i32, %c0_i32_0 : i32, i32
  }
  func.func @transform_11(%arg0: i32) -> (i32, i32) {
    %c0_i32 = arith.constant 0 : i32
    %c0_i32_0 = arith.constant 0 : i32
    %c0_i32_1 = arith.constant 0 : i32
    return %c0_i32, %c0_i32_0 : i32, i32
  }
  func.func @transform_12(%arg0: i32) -> (i32, i32) {
    %c0_i32 = arith.constant 0 : i32
    %c0_i32_0 = arith.constant 0 : i32
    %c0_i32_1 = arith.constant 0 : i32
    return %c0_i32, %c0_i32_0 : i32, i32
  }
  func.func @transform_13(%arg0: i32) -> (i32, i32) {
    %c0_i32 = arith.constant 0 : i32
    %c0_i32_0 = arith.constant 0 : i32
    %c0_i32_1 = arith.constant 0 : i32
    return %c0_i32, %c0_i32_0 : i32, i32
  }
  func.func @transform_14(%arg0: i32) -> (i32, i32) {
    %c0_i32 = arith.constant 0 : i32
    %c0_i32_0 = arith.constant 0 : i32
    return %arg0, %c0_i32 : i32, i32
  }
}

</mosaic_0001>

<bundles_post_ra>
// kernel: vae_forward.1
= control target key start
LH: loop header
LB: loop body
LE: loop exit
PB: predicated region body
PF: predicated region fallthrough
CT: control target
= control target key end

     0   :  { %19 = vsyncpa [#allocation3], 0  ;;  %s2210_s0 = inlined_call_operand.vmem [shape: f32[64,128], index: 0, kind: input, shape index: {}]   ;;  %s2211_s1 = inlined_call_operand.vmem [shape: f32[64,128], index: 1, kind: input, shape index: {}]   ;;  %s2212_s2 = inlined_call_operand.vmem [shape: f32[128,128], index: 2, kind: input, shape index: {}]   ;;  %s2213_s3 = inlined_call_operand.vmem [shape: f32[1,128], index: 3, kind: input, shape index: {}]   ;;  %s2214_s4 = inlined_call_operand.vmem [shape: f32[128,128], index: 4, kind: input, shape index: {}]   ;;  %s2215_s5 = inlined_call_operand.vmem [shape: f32[1,128], index: 5, kind: input, shape index: {}]   ;;  %s2216_s6 = inlined_call_operand.vmem [shape: f32[128,256], index: 6, kind: input, shape index: {}]   ;;  %s2217_s7 = inlined_call_operand.vmem [shape: f32[1,256], index: 7, kind: input, shape index: {}]   ;;  %s2218_s8 = inlined_call_operand.vmem [shape: f32[128,128], index: 8, kind: input, shape index: {}]   ;;  %s2219_s9 = inlined_call_operand.vmem [shape: f32[1,128], index: 9, kind: input, shape index: {}]   ;;  %s2220_s10 = inlined_call_operand.hbm [shape: f32[128,128], index: 10, kind: input, shape index: {}]   ;;  %s2221_s11 = inlined_call_operand.vmem [shape: f32[1,128], index: 11, kind: input, shape index: {}]   ;;  %s2222_s12 = inlined_call_operand.hbm [shape: f32[128,128], index: 12, kind: input, shape index: {}]   ;;  %s2223_s13 = inlined_call_operand.vmem [shape: f32[1,128], index: 13, kind: input, shape index: {}]   ;;  %s2224_s14 = inlined_call_operand.vmem [shape: f32[64,512], index: 14, kind: output, shape index: {}]  }
   0x1   :  { %20 = vsyncpa [#allocation5], 0  ;;  %s1852_s29 = smov 0  }
   0x2 LB: > { %s1350_s30 = sadd.s32 4294967295, %s1770_s29   ;;  %p1352_p0 = scmp.ge.s32.totalorder %s1770_s29, 1  ;;  %s1770_s29 = sphi %s1852_s29, %s26_s29  }
   0x3   : > { %p361_p1 = scmp.lt.s32.totalorder %s1770_s29, 3  ;;  %s1772_s15 = smov [#allocation2]  }
   0x4   : > { %s397_s16 = sshll.u32 %s1772_s15, 4  ;;  %p1866_p3 = scmp.eq.s32.totalorder %s1350_s30, 0  ;;  %s398_s16 = int_to_ptr.vmem [resolvable:$true] %s397_s16 }
   0x5   : > { %p1860_p2 = pnand %p1352_p0, %p361_p1  ;;  %s1773_s19 = smov [#allocation4]  }
   0x6   : > { %s413_s20 = sshll.u32 %s1773_s19, 4  ;;  %s1715_s22 = scalar_lea.vmem %s398_s16, 2048  ;;  %s414_s20 = int_to_ptr.vmem [resolvable:$true] %s413_s20 }
   0x7   : > { %p1672_p4 = pneg %p1860_p2  ;;  %p1716_p7 = scmp.ne.s32.totalorder %s398_s16, %s1715_s22 }
   0x8   : > { %p1723_p10 = scmp.lt.s32.totalorder %s398_s16, %s398_s16  ;;  %p1724_p11 = scmp.lt.s32.totalorder %s1715_s22, %s1715_s22 }
   0x9   : > { %p1874_p5 = pnand %p1866_p3, %p1672_p4 }
   0xa   : > { %p1725_p12 = por %p1724_p11, %p1723_p10 }
   0xb   : > { %p1706_p6 = pneg %p1874_p5 }
   0xd   : > { %p1718_p8 = pnand %p1716_p7, %p1706_p6 }
   0xf   : > { %p1719_p9 = pneg %p1718_p8 }
  0x11   : > { %p1726_p13 = pnand %p1725_p12, %p1719_p9 }
  0x13   : > { %1729 = shalt.err (!%p1726_p13)
}
  0x14   : > { %s1774_s23 = smov 128   ;;  %s1775_s24 = smov 8  }
  0x15   : > { %1675 = dma.hbm_to_vmem [thread:$0]  (!%p1874_p5), %s2220_s10, 2048, %s398_s16, [#allocation3], %s1774_s23, %s1774_s23, %s1775_s24  }
  0x16   : > { %s1741_s27 = scalar_lea.vmem %s414_s20, 2048  ;;  %p1749_p7 = scmp.lt.s32.totalorder %s414_s20, %s414_s20 }
  0x17   : > { %p1742_p0 = scmp.ne.s32.totalorder %s414_s20, %s1741_s27  ;;  %p1750_p8 = scmp.lt.s32.totalorder %s1741_s27, %s1741_s27 }
  0x19   : > { %p1744_p1 = pnand %p1742_p0, %p1706_p6  ;;  %p1751_p10 = por %p1750_p8, %p1749_p7 }
  0x1b   : > { %p1745_p4 = pneg %p1744_p1 }
  0x1d   : > { %p1752_p9 = pnand %p1751_p10, %p1745_p4 }
  0x1f   : > { %1755 = shalt.err (!%p1752_p9)
}
  0x20   : > { %1678 = dma.hbm_to_vmem [thread:$0]  (!%p1874_p5), %s2222_s12, 2048, %s414_s20, [#allocation5], %s1774_s23, %s1774_s23, %s1775_s24  }
  0x21   : > { %450 = sbr.rel (%p1860_p2) target bundleno = 1302 (0x516), region = 76 }
  0x26   : > { %1761 = dma.done.wait (%p1866_p3), [#allocation3], 2048  }
  0x27   : > { %1763 = vsyncadd (%p1866_p3), [#allocation3], 4294965248 }
  0x28   : > { %1765 = dma.done.wait (%p1866_p3), [#allocation5], 2048  }
  0x29   : > { %1767 = vsyncadd (%p1866_p3), [#allocation5], 4294965248  ;;  %s1359_s16 = sshll.u32 %s1350_s30, 2  ;;  %v544_v0 = vld [vmem:[%s2212_s2 + $0x78] sm:$0xff]  ;;  %v543_v1 = vld [vmem:[%s2212_s2 + $0x70] sm:$0xff] }
  0x2a   : > { %p507_p6 = scmp.lt.s32.totalorder %s1359_s16, 7  ;;  %1474 = vmatprep.subr.mxu0 %v544_v0  ;;  %v542_v2 = vld [vmem:[%s2212_s2 + $0x68] sm:$0xff]  ;;  %v541_v3 = vld [vmem:[%s2212_s2 + $0x60] sm:$0xff]  ;;  %v540_v5 = vld [vmem:[%s2212_s2 + $0x58] sm:$0xff] }
  0x2b   : > { %1475 = vmatpush3.msra.mxu0 %v544_v0  ;;  %v656_v6 = vld [vmem:[%s2214_s4 + $0x78] sm:$0xff]  ;;  %v655_v7 = vld [vmem:[%s2214_s4 + $0x70] sm:$0xff]  ;;  %v654_v9 = vld [vmem:[%s2214_s4 + $0x68] sm:$0xff] }
  0x2c   : > { %s2229_s16 = smov (!%p507_p6, %s1359_s16), 7  ;;  %1476 = vmatprep.subr.mxu0 %v543_v1  ;;  %v539_v8 = vld [vmem:[%s2212_s2 + $0x50] sm:$0xff]  ;;  %1512 = vmatprep.subr.mxu1 %v656_v6  ;;  %v538_v10 = vld [vmem:[%s2212_s2 + $0x48] sm:$0xff]  ;;  %v653_v11 = vld [vmem:[%s2214_s4 + $0x60] sm:$0xff] }
  0x2d   : > { %s1360_s17 = sshll.u32 %s2229_s16, 3  ;;  %1477 = vmatpush3.msra.mxu0 %v543_v1  ;;  %1513 = vmatpush3.msra.mxu1 %v656_v6  ;;  %v537_v12 = vld [vmem:[%s2212_s2 + $0x40] sm:$0xff]  ;;  %v652_v13 = vld [vmem:[%s2214_s4 + $0x58] sm:$0xff]  ;;  %v651_v15 = vld [vmem:[%s2214_s4 + $0x50] sm:$0xff] }
  0x2e   : > { %s1925_s25 = scalar_lea.vmem %s2210_s0, %s1360_s17  ;;  %1478 = vmatprep.subr.mxu0 %v542_v2  ;;  %1514 = vmatprep.subr.mxu1 %v655_v7  ;;  %v536_v14 = vld [vmem:[%s2212_s2 + $0x38] sm:$0xff]  ;;  %v535_v16 = vld [vmem:[%s2212_s2 + $0x30] sm:$0xff]  ;;  %v650_v17 = vld [vmem:[%s2214_s4 + $0x48] sm:$0xff]  ;;  %s516_s27 = scalar_lea.vmem %s2211_s1, %s1360_s17 }
  0x2f   : > { %v525_v4 = vld [vmem:[%s1925_s25] sm:$0xff]  ;;  %1479 = vmatpush3.msra.mxu0 %v542_v2  ;;  %1515 = vmatpush3.msra.mxu1 %v655_v7  ;;  %v534_v18 = vld [vmem:[%s2212_s2 + $0x28] sm:$0xff]  ;;  %v648_v21 = vld [vmem:[%s2214_s4 + $0x38] sm:$0xff] }
  0x30   : > { %1506 = vmatprep.mubr.f32.mxu0 %v525_v4  ;;  %1480 = vmatprep.subr.mxu0 %v541_v3  ;;  %v649_v19 = vld [vmem:[%s2214_s4 + $0x40] sm:$0xff]  ;;  %v532_v22 = vld [vmem:[%s2212_s2 + $0x18] sm:$0xff]  ;;  %v647_v23 = vld [vmem:[%s2214_s4 + $0x30] sm:$0xff] }
  0x31   : > { %1481 = vmatpush3.msra.mxu0 %v541_v3  ;;  %1516 = vmatprep.subr.mxu1 %v654_v9  ;;  %v533_v20 = vld [vmem:[%s2212_s2 + $0x20] sm:$0xff]  ;;  %v531_v24 = vld [vmem:[%s2212_s2 + $0x10] sm:$0xff]  ;;  %v646_v25 = vld [vmem:[%s2214_s4 + $0x28] sm:$0xff] }
  0x32   : > { %1482 = vmatprep.subr.mxu0 %v540_v5  ;;  %1517 = vmatpush3.msra.mxu1 %v654_v9  ;;  %v530_v26 = vld [vmem:[%s2212_s2 + $0x8] sm:$0xff]  ;;  %v645_v27 = vld [vmem:[%s2214_s4 + $0x20] sm:$0xff]  ;;  %v527_v30 = vld [vmem:[%s1925_s25 + $0x10] sm:$0xff] }
  0x33   : > { %1483 = vmatpush3.msra.mxu0 %v540_v5  ;;  %1518 = vmatprep.subr.mxu1 %v653_v11  ;;  %v529_v28 = vld [vmem:[%s2212_s2] sm:$0xff]  ;;  %v526_v29 = vld [vmem:[%s1925_s25 + $0x8] sm:$0xff]  ;;  %v528_v31 = vld [vmem:[%s1925_s25 + $0x18] sm:$0xff]  ;;  %s1373_s25 = sshll.u32 %s2229_s16, 5 }
  0x34   : > { %1484 = vmatprep.subr.mxu0 %v539_v8  ;;  %1519 = vmatpush3.msra.mxu1 %v653_v11  ;;  %v644_v32 = vld [vmem:[%s2214_s4 + $0x18] sm:$0xff]  ;;  %v643_v33 = vld [vmem:[%s2214_s4 + $0x10] sm:$0xff]  ;;  %v642_v34 = vld [vmem:[%s2214_s4 + $0x8] sm:$0xff]  ;;  %s2175_s30 = scalar_lea.vmem %s2224_s14, %s1373_s25 }
  0x35   : > { %1485 = vmatpush3.msra.mxu0 %v539_v8  ;;  %1520 = vmatprep.subr.mxu1 %v652_v13  ;;  %v641_v35 = vld [vmem:[%s2214_s4] sm:$0xff]  ;;  %v784_v36 = vld [vmem:[%s2216_s6 + $0xf8] sm:$0xff]  ;;  %v783_v37 = vld [vmem:[%s2216_s6 + $0xf0] sm:$0xff] }
  0x36   : > { %1486 = vmatprep.subr.mxu0 %v538_v10  ;;  %1521 = vmatpush3.msra.mxu1 %v652_v13  ;;  %v782_v38 = vld [vmem:[%s2216_s6 + $0xe8] sm:$0xff]  ;;  %v781_v39 = vld [vmem:[%s2216_s6 + $0xe0] sm:$0xff]  ;;  %v780_v40 = vld [vmem:[%s2216_s6 + $0xd8] sm:$0xff] }
  0x37   : > { %1487 = vmatpush3.msra.mxu0 %v538_v10  ;;  %1522 = vmatprep.subr.mxu1 %v651_v15  ;;  %v779_v41 = vld [vmem:[%s2216_s6 + $0xd0] sm:$0xff]  ;;  %v778_v42 = vld [vmem:[%s2216_s6 + $0xc8] sm:$0xff]  ;;  %v777_v43 = vld [vmem:[%s2216_s6 + $0xc0] sm:$0xff] }
  0x38   : > { %1488 = vmatprep.subr.mxu0 %v537_v12  ;;  %1523 = vmatpush3.msra.mxu1 %v651_v15  ;;  %v776_v44 = vld [vmem:[%s2216_s6 + $0xb8] sm:$0xff]  ;;  %v775_v45 = vld [vmem:[%s2216_s6 + $0xb0] sm:$0xff]  ;;  %v774_v46 = vld [vmem:[%s2216_s6 + $0xa8] sm:$0xff] }
  0x39   : > { %1489 = vmatpush3.msra.mxu0 %v537_v12  ;;  %1524 = vmatprep.subr.mxu1 %v650_v17  ;;  %v773_v47 = vld [vmem:[%s2216_s6 + $0xa0] sm:$0xff]  ;;  %v772_v48 = vld [vmem:[%s2216_s6 + $0x98] sm:$0xff]  ;;  %v771_v49 = vld [vmem:[%s2216_s6 + $0x90] sm:$0xff] }
  0x3a   : > { %1490 = vmatprep.subr.mxu0 %v536_v14  ;;  %1525 = vmatpush3.msra.mxu1 %v650_v17  ;;  %v770_v50 = vld [vmem:[%s2216_s6 + $0x88] sm:$0xff]  ;;  %v769_v51 = vld [vmem:[%s2216_s6 + $0x80] sm:$0xff]  ;;  %v768_v52 = vld [vmem:[%s2216_s6 + $0x78] sm:$0xff]  ;;  %v1776_v17 = vmov 0.0  }
  0x3b   : > { %1491 = vmatpush3.msra.mxu0 %v536_v14  ;;  %1526 = vmatprep.subr.mxu1 %v649_v19  ;;  %v767_v53 = vld [vmem:[%s2216_s6 + $0x70] sm:$0xff]  ;;  %v766_v54 = vld [vmem:[%s2216_s6 + $0x68] sm:$0xff]  ;;  %v765_v55 = vld [vmem:[%s2216_s6 + $0x60] sm:$0xff] }
  0x3c   : > { %1492 = vmatprep.subr.mxu0 %v535_v16  ;;  %1527 = vmatpush3.msra.mxu1 %v649_v19  ;;  %v764_v56 = vld [vmem:[%s2216_s6 + $0x58] sm:$0xff]  ;;  %v763_v57 = vld [vmem:[%s2216_s6 + $0x50] sm:$0xff]  ;;  %v762_v58 = vld [vmem:[%s2216_s6 + $0x48] sm:$0xff] }
  0x3d   : > { %1493 = vmatpush3.msra.mxu0 %v535_v16  ;;  %1528 = vmatprep.subr.mxu1 %v648_v21  ;;  %v761_v59 = vld [vmem:[%s2216_s6 + $0x40] sm:$0xff]  ;;  %v760_v60 = vld [vmem:[%s2216_s6 + $0x38] sm:$0xff]  ;;  %v759_v10 = vld [vmem:[%s2216_s6 + $0x30] sm:$0xff] }
  0x3e   : > { %1494 = vmatprep.subr.mxu0 %v534_v18  ;;  %1529 = vmatpush3.msra.mxu1 %v648_v21  ;;  %v1366_v61 = vld [vmem:[%s2213_s3] ss:$0 sm:$0xff]  ;;  %v758_v11 = vld [vmem:[%s2216_s6 + $0x28] sm:$0xff]  ;;  %v756_v13 = vld [vmem:[%s2216_s6 + $0x18] sm:$0xff] }
  0x3f   : > { %1495 = vmatpush3.msra.mxu0 %v534_v18  ;;  %1530 = vmatprep.subr.mxu1 %v647_v23  ;;  %v757_v12 = vld [vmem:[%s2216_s6 + $0x20] sm:$0xff]  ;;  %v755_v14 = vld [vmem:[%s2216_s6 + $0x10] sm:$0xff]  ;;  %v754_v15 = vld [vmem:[%s2216_s6 + $0x8] sm:$0xff] }
  0x40   : > { %1496 = vmatprep.subr.mxu0 %v533_v20  ;;  %1531 = vmatpush3.msra.mxu1 %v647_v23  ;;  %v753_v16 = vld [vmem:[%s2216_s6] sm:$0xff]  ;;  %v925_v18 = vld [vmem:[%s2218_s8 + $0x78] sm:$0xff] }
  0x41   : > { %1497 = vmatpush3.msra.mxu0 %v533_v20  ;;  %1532 = vmatprep.subr.mxu1 %v646_v25  ;;  %v1367_v20 = vld [vmem:[%s2215_s5] ss:$0 sm:$0xff] }
  0x42   : > { %1498 = vmatprep.subr.mxu0 %v532_v22  ;;  %1533 = vmatpush3.msra.mxu1 %v646_v25 }
  0x43   : > { %1499 = vmatpush3.msra.mxu0 %v532_v22  ;;  %1534 = vmatprep.subr.mxu1 %v645_v27 }
  0x44   : > { %1500 = vmatprep.subr.mxu0 %v531_v24  ;;  %1535 = vmatpush3.msra.mxu1 %v645_v27 }
  0x45   : > { %1501 = vmatpush3.msra.mxu0 %v531_v24  ;;  %1536 = vmatprep.subr.mxu1 %v644_v32 }
  0x46   : > { %1502 = vmatprep.subr.mxu0 %v530_v26  ;;  %1537 = vmatpush3.msra.mxu1 %v644_v32  ;;  %v924_v32 = vld [vmem:[%s2218_s8 + $0x70] sm:$0xff] }
  0x47   : > { %1503 = vmatpush3.msra.mxu0 %v530_v26  ;;  %1538 = vmatprep.subr.mxu1 %v643_v33 }
  0x48   : > { %1504 = vmatprep.subr.mxu0 %v529_v28  ;;  %1539 = vmatpush3.msra.mxu1 %v643_v33  ;;  %v923_v33 = vld [vmem:[%s2218_s8 + $0x68] sm:$0xff] }
  0x49   : > { %1505 = vmatpush3.msra.mxu0 %v529_v28  ;;  %1540 = vmatprep.subr.mxu1 %v642_v34 }
  0x4a   : > { %1507 = vmatmul.mubr.f32.vlgmr.msra.gmra.mxu0 %v526_v29  ;;  %1541 = vmatpush3.msra.mxu1 %v642_v34  ;;  %v922_v34 = vld [vmem:[%s2218_s8 + $0x60] sm:$0xff] }
  0x4b   : > { %1509 = vmatprep.mubr.f32.mxu0 %v527_v30  ;;  %1542 = vmatprep.subr.mxu1 %v641_v35 }
  0x4c   : > { %1543 = vmatpush3.msra.mxu1 %v641_v35  ;;  %797 = vmatprep.subr.mxu0 %v784_v36  ;;  %v921_v35 = vld [vmem:[%s2218_s8 + $0x58] sm:$0xff]  ;;  %v920_v36 = vld [vmem:[%s2218_s8 + $0x50] sm:$0xff] }
  0x4d   : > { %798 = vmatpush1.msra.mxu0 %v783_v37  ;;  %1550 = vmatprep.subr.mxu1 %v925_v18  ;;  %v919_v37 = vld [vmem:[%s2218_s8 + $0x48] sm:$0xff] }
  0x4e   : > { %1510 = vmatmul.mubr.f32.gmra.mxu0 %v528_v31  ;;  %799 = vmatprep.subr.mxu0 %v782_v38  ;;  %v918_v38 = vld [vmem:[%s2218_s8 + $0x40] sm:$0xff] }
  0x4f   : > { %800 = vmatpush1.msra.mxu0 %v781_v39  ;;  %861 = vmatprep.mubr.f32.mxu0 %v1776_v17  ;;  %v917_v39 = vld [vmem:[%s2218_s8 + $0x38] sm:$0xff] }
  0x50   : > { %801 = vmatprep.subr.mxu0 %v780_v40  ;;  %v916_v40 = vld [vmem:[%s2218_s8 + $0x30] sm:$0xff] }
  0x51   : > { %802 = vmatpush1.msra.mxu0 %v779_v41  ;;  %v915_v41 = vld [vmem:[%s2218_s8 + $0x28] sm:$0xff] }
  0x52   : > { %803 = vmatprep.subr.mxu0 %v778_v42  ;;  %v914_v42 = vld [vmem:[%s2218_s8 + $0x20] sm:$0xff] }
  0x53   : > { %804 = vmatpush1.msra.mxu0 %v777_v43  ;;  %v913_v43 = vld [vmem:[%s2218_s8 + $0x18] sm:$0xff] }
  0x54   : > { %805 = vmatprep.subr.mxu0 %v776_v44  ;;  %v912_v44 = vld [vmem:[%s2218_s8 + $0x10] sm:$0xff] }
  0x55   : > { %806 = vmatpush1.msra.mxu0 %v775_v45  ;;  %v911_v45 = vld [vmem:[%s2218_s8 + $0x8] sm:$0xff] }
  0x56   : > { %807 = vmatprep.subr.mxu0 %v774_v46  ;;  %v910_v46 = vld [vmem:[%s2218_s8] sm:$0xff] }
  0x57   : > { %808 = vmatpush1.msra.mxu0 %v773_v47  ;;  %v1037_v47 = vld [vmem:[#allocation2 + $0x78] sm:$0xff] }
  0x58   : > { %809 = vmatprep.subr.mxu0 %v772_v48  ;;  %v1036_v48 = vld [vmem:[#allocation2 + $0x70] sm:$0xff] }
  0x59   : > { %810 = vmatpush1.msra.mxu0 %v771_v49  ;;  %v1035_v49 = vld [vmem:[#allocation2 + $0x68] sm:$0xff] }
  0x5a   : > { %811 = vmatprep.subr.mxu0 %v770_v50  ;;  %v1034_v50 = vld [vmem:[#allocation2 + $0x60] sm:$0xff] }
  0x5b   : > { %812 = vmatpush1.msra.mxu0 %v769_v51  ;;  %v1033_v51 = vld [vmem:[#allocation2 + $0x58] sm:$0xff] }
  0x5c   : > { %813 = vmatprep.subr.mxu0 %v768_v52  ;;  %v1032_v52 = vld [vmem:[#allocation2 + $0x50] sm:$0xff] }
  0x5d   : > { %814 = vmatpush1.msra.mxu0 %v767_v53  ;;  %v1031_v53 = vld [vmem:[#allocation2 + $0x48] sm:$0xff] }
  0x5e   : > { %815 = vmatprep.subr.mxu0 %v766_v54  ;;  %v1030_v54 = vld [vmem:[#allocation2 + $0x40] sm:$0xff] }
  0x5f   : > { %816 = vmatpush1.msra.mxu0 %v765_v55  ;;  %v1029_v55 = vld [vmem:[#allocation2 + $0x38] sm:$0xff] }
  0x60   : > { %817 = vmatprep.subr.mxu0 %v764_v56  ;;  %v1028_v56 = vld [vmem:[#allocation2 + $0x30] sm:$0xff] }
  0x61   : > { %818 = vmatpush1.msra.mxu0 %v763_v57  ;;  %v1027_v57 = vld [vmem:[#allocation2 + $0x28] sm:$0xff] }
  0x62   : > { %819 = vmatprep.subr.mxu0 %v762_v58  ;;  %v1026_v58 = vld [vmem:[#allocation2 + $0x20] sm:$0xff] }
  0x63   : > { %820 = vmatpush1.msra.mxu0 %v761_v59  ;;  %v787_v59 = vlaneseq }
  0x64   : > { %821 = vmatprep.subr.mxu0 %v760_v60 }
  0x65   : > { %822 = vmatpush1.msra.mxu0 %v759_v10  ;;  %v788_v60 = vshrl.u32 %v787_v59, 7 }
  0x66   : > { %823 = vmatprep.subr.mxu0 %v758_v11 }
  0x67   : > { %824 = vmatpush1.msra.mxu0 %v757_v12 }
  0x68   : > { %825 = vmatprep.subr.mxu0 %v756_v13 }
  0x69   : > { %826 = vmatpush1.msra.mxu0 %v755_v14 }
  0x6a   : > { %827 = vmatprep.subr.mxu0 %v754_v15 }
  0x6b   : > { %828 = vmatpush1.msra.mxu0 %v753_v16 }
  0x6c   : > { %1588 = vmatprep.subr.mxu0 %v1037_v47 }
 0x10a   : > { %v1508_v62 = vpop.f32.mrf.mxu0 }
 0x10b   : > { %v624_v63 = vadd.f32 %v1508_v62, %v1366_v61  ;;  %v785_v62 = vld [vmem:[%s2217_s7] sm:$0x3] }
 0x10c   : > { %v618_v0 = vpop.f32.mrf.mxu0 }
 0x10d   : > { %v619_v1 = vadd.f32 %v1366_v61, %v618_v0  ;;  %v638_v5 = vmax.f32 %v624_v63, 0.0  ;;  %v793_v63 = vsub.s32 1, %v788_v60 }
 0x10e   : > { %v1511_v2 = vpop.f32.mrf.mxu0 }
 0x10f   : > { %v634_v3 = vadd.f32 %v1511_v2, %v1366_v61  ;;  %v637_v4 = vmax.f32 %v619_v1, 0.0  ;;  %v794_v1 = vrot.slane %v785_v62, %v793_v63 }
 0x110   : > { %v628_v6 = vpop.f32.mrf.mxu0 }
 0x111   : > { %v629_v7 = vadd.f32 %v1366_v61, %v628_v6  ;;  %1544 = vmatprep.mubr.f32.mxu1 %v637_v4  ;;  %v640_v8 = vmax.f32 %v634_v3, 0.0  ;;  %v789_v61 = vsub.s32 0, %v788_v60 }
 0x112   : > { %1545 = vmatmul.mubr.f32.vlgmr.msra.gmra.mxu1 %v638_v5 }
 0x113   : > { %v639_v9 = vmax.f32 %v629_v7, 0.0  ;;  %1551 = vmatpush3.msra.mxu1 %v925_v18  ;;  %v790_v0 = vrot.slane %v785_v62, %v789_v61 }
 0x114   : > { %1552 = vmatprep.subr.mxu1 %v924_v32 }
 0x115   : > { %1547 = vmatprep.mubr.f32.mxu1 %v639_v9  ;;  %1553 = vmatpush3.msra.mxu1 %v924_v32 }
 0x116   : > { %1548 = vmatmul.mubr.f32.gmra.mxu1 %v640_v8  ;;  %1554 = vmatprep.subr.mxu1 %v923_v33 }
 0x117   : > { %1555 = vmatpush3.msra.mxu1 %v923_v33  ;;  %v900_v33 = vld [vmem:[%s516_s27 + $0x10] sm:$0xff] }
 0x118   : > { %1556 = vmatprep.subr.mxu1 %v922_v34 }
 0x119   : > { %1557 = vmatpush3.msra.mxu1 %v922_v34 }
 0x11a   : > { %1558 = vmatprep.subr.mxu1 %v921_v35 }
 0x11b   : > { %1559 = vmatpush3.msra.mxu1 %v921_v35 }
 0x11c   : > { %1560 = vmatprep.subr.mxu1 %v920_v36 }
 0x11d   : > { %1561 = vmatpush3.msra.mxu1 %v920_v36 }
 0x11e   : > { %1562 = vmatprep.subr.mxu1 %v919_v37 }
 0x11f   : > { %1563 = vmatpush3.msra.mxu1 %v919_v37  ;;  %v901_v37 = vld [vmem:[%s516_s27 + $0x18] sm:$0xff] }
 0x120   : > { %1564 = vmatprep.subr.mxu1 %v918_v38 }
 0x121   : > { %1565 = vmatpush3.msra.mxu1 %v918_v38 }
 0x122   : > { %1566 = vmatprep.subr.mxu1 %v917_v39 }
 0x123   : > { %1567 = vmatpush3.msra.mxu1 %v917_v39 }
 0x124   : > { %1568 = vmatprep.subr.mxu1 %v916_v40 }
 0x125   : > { %1569 = vmatpush3.msra.mxu1 %v916_v40 }
 0x126   : > { %1570 = vmatprep.subr.mxu1 %v915_v41 }
 0x127   : > { %1571 = vmatpush3.msra.mxu1 %v915_v41 }
 0x128   : > { %1572 = vmatprep.subr.mxu1 %v914_v42 }
 0x129   : > { %1573 = vmatpush3.msra.mxu1 %v914_v42  ;;  %v1025_v42 = vld [vmem:[#allocation2 + $0x18] sm:$0xff] }
 0x12a   : > { %1574 = vmatprep.subr.mxu1 %v913_v43 }
 0x12b   : > { %1575 = vmatpush3.msra.mxu1 %v913_v43  ;;  %v1024_v43 = vld [vmem:[#allocation2 + $0x10] sm:$0xff] }
 0x12c   : > { %1576 = vmatprep.subr.mxu1 %v912_v44 }
 0x12d   : > { %1577 = vmatpush3.msra.mxu1 %v912_v44  ;;  %v1023_v44 = vld [vmem:[#allocation2 + $0x8] sm:$0xff] }
 0x12e   : > { %1578 = vmatprep.subr.mxu1 %v911_v45 }
 0x12f   : > { %1579 = vmatpush3.msra.mxu1 %v911_v45  ;;  %v1022_v45 = vld [vmem:[#allocation2] sm:$0xff] }
 0x130   : > { %1580 = vmatprep.subr.mxu1 %v910_v46 }
 0x131   : > { %1581 = vmatpush3.msra.mxu1 %v910_v46  ;;  %v1149_v46 = vld [vmem:[#allocation4 + $0x78] sm:$0xff] }
 0x132   : > { %1626 = vmatprep.subr.mxu1 %v1149_v46 }
 0x1d2   : > { %v1546_v19 = vpop.f32.mrf.mxu1 }
 0x1d3   : > { %v736_v24 = vadd.f32 %v1546_v19, %v1367_v20 }
 0x1d4   : > { %v730_v21 = vpop.f32.mrf.mxu1 }
 0x1d5   : > { %v731_v22 = vadd.f32 %v1367_v20, %v730_v21  ;;  %v750_v27 = vmax.f32 %v736_v24, 0.0 }
 0x1d6   : > { %v1549_v23 = vpop.f32.mrf.mxu1 }
 0x1d7   : > { %v749_v25 = vmax.f32 %v731_v22, 0.0  ;;  %v746_v29 = vadd.f32 %v1549_v23, %v1367_v20 }
 0x1d8   : > { %v740_v26 = vpop.f32.mrf.mxu1 }
 0x1d9   : > { %862 = vmatmul.mubr.f32.vlgmr.msra.gmra.mxu0 %v749_v25  ;;  %v741_v28 = vadd.f32 %v1367_v20, %v740_v26  ;;  %v752_v31 = vmax.f32 %v746_v29, 0.0  ;;  %v898_v26 = vld [vmem:[%s516_s27] sm:$0xff]  ;;  %v899_v29 = vld [vmem:[%s516_s27 + $0x8] sm:$0xff] }
 0x1da   : > { %867 = vmatprep.mubr.f32.mxu0 %v1776_v17  ;;  %1589 = vmatpush3.msra.mxu0 %v1037_v47  ;;  %v1148_v47 = vld [vmem:[#allocation4 + $0x70] sm:$0xff] }
 0x1db   : > { %v751_v30 = vmax.f32 %v741_v28, 0.0  ;;  %1590 = vmatprep.subr.mxu0 %v1036_v48 }
 0x1dc   : > { %1591 = vmatpush3.msra.mxu0 %v1036_v48  ;;  %v1147_v48 = vld [vmem:[#allocation4 + $0x68] sm:$0xff] }
 0x1dd   : > { %868 = vmatmul.mubr.f32.gmra.mxu0 %v750_v27  ;;  %1592 = vmatprep.subr.mxu0 %v1035_v49 }
 0x1de   : > { %873 = vmatprep.mubr.f32.mxu0 %v1776_v17  ;;  %1593 = vmatpush3.msra.mxu0 %v1035_v49  ;;  %v1146_v49 = vld [vmem:[#allocation4 + $0x60] sm:$0xff] }
 0x1df   : > { %1594 = vmatprep.subr.mxu0 %v1034_v50 }
 0x1e0   : > { %1595 = vmatpush3.msra.mxu0 %v1034_v50  ;;  %v1145_v50 = vld [vmem:[#allocation4 + $0x58] sm:$0xff] }
 0x1e1   : > { %874 = vmatmul.mubr.f32.gmra.mxu0 %v751_v30  ;;  %1596 = vmatprep.subr.mxu0 %v1033_v51 }
 0x1e2   : > { %879 = vmatprep.mubr.f32.mxu0 %v1776_v17  ;;  %1597 = vmatpush3.msra.mxu0 %v1033_v51  ;;  %v1144_v51 = vld [vmem:[#allocation4 + $0x50] sm:$0xff] }
 0x1e3   : > { %1598 = vmatprep.subr.mxu0 %v1032_v52 }
 0x1e4   : > { %1599 = vmatpush3.msra.mxu0 %v1032_v52  ;;  %v1143_v52 = vld [vmem:[#allocation4 + $0x48] sm:$0xff] }
 0x1e5   : > { %880 = vmatmul.mubr.f32.gmra.mxu0 %v752_v31  ;;  %1600 = vmatprep.subr.mxu0 %v1031_v53 }
 0x1e6   : > { %1601 = vmatpush3.msra.mxu0 %v1031_v53  ;;  %v1142_v53 = vld [vmem:[#allocation4 + $0x40] sm:$0xff] }
 0x1e7   : > { %1602 = vmatprep.subr.mxu0 %v1030_v54 }
 0x1e8   : > { %1603 = vmatpush3.msra.mxu0 %v1030_v54  ;;  %v1141_v54 = vld [vmem:[#allocation4 + $0x38] sm:$0xff] }
 0x1e9   : > { %1604 = vmatprep.subr.mxu0 %v1029_v55 }
 0x1ea   : > { %1605 = vmatpush3.msra.mxu0 %v1029_v55  ;;  %v1140_v55 = vld [vmem:[#allocation4 + $0x30] sm:$0xff] }
 0x1eb   : > { %1606 = vmatprep.subr.mxu0 %v1028_v56 }
 0x1ec   : > { %1607 = vmatpush3.msra.mxu0 %v1028_v56  ;;  %v1139_v56 = vld [vmem:[#allocation4 + $0x28] sm:$0xff] }
 0x1ed   : > { %1608 = vmatprep.subr.mxu0 %v1027_v57 }
 0x1ee   : > { %1609 = vmatpush3.msra.mxu0 %v1027_v57  ;;  %v1138_v57 = vld [vmem:[#allocation4 + $0x20] sm:$0xff] }
 0x1ef   : > { %1610 = vmatprep.subr.mxu0 %v1026_v58 }
 0x1f0   : > { %1611 = vmatpush3.msra.mxu0 %v1026_v58  ;;  %v1368_v58 = vld [vmem:[%s2219_s9] ss:$0 sm:$0xff] }
 0x1f1   : > { %1612 = vmatprep.subr.mxu0 %v1025_v42 }
 0x1f2   : > { %1613 = vmatpush3.msra.mxu0 %v1025_v42 }
 0x1f3   : > { %1614 = vmatprep.subr.mxu0 %v1024_v43 }
 0x1f4   : > { %1615 = vmatpush3.msra.mxu0 %v1024_v43 }
 0x1f5   : > { %1616 = vmatprep.subr.mxu0 %v1023_v44 }
 0x1f6   : > { %1617 = vmatpush3.msra.mxu0 %v1023_v44 }
 0x1f7   : > { %1618 = vmatprep.subr.mxu0 %v1022_v45 }
 0x1f8   : > { %1619 = vmatpush3.msra.mxu0 %v1022_v45 }
 0x299   : > { %v863_v2 = vpop.f32.mrf.mxu0 }
 0x29a   : > { %v864_v3 = vadd.f32 %v863_v2, %v790_v0 }
 0x29b   : > { %v865_v4 = vpop.f32.mrf.mxu0 }
 0x29c   : > { %1250 = vst [vmem:[%s2175_s30 + $0x10] sm:$0xff] %v864_v3  ;;  %v866_v5 = vadd.f32 %v865_v4, %v794_v1 }
 0x29d   : > { %v869_v6 = vpop.f32.mrf.mxu0 }
 0x29e   : > { %v886_v7 = vmul.f32 0.5, %v866_v5  ;;  %v870_v8 = vadd.f32 %v869_v6, %v790_v0 }
 0x29f   : > { %v871_v9 = vpop.f32.mrf.mxu0 }
 0x2a0   : > { %v890_v10 = vmul.f32 1.442695, %v886_v7  ;;  %1251 = vst [vmem:[%s2175_s30 + $0x30] sm:$0xff] %v870_v8  ;;  %v872_v11 = vadd.f32 %v871_v9, %v794_v1  ;;  %v1137_v7 = vld [vmem:[#allocation4 + $0x18] sm:$0xff]  ;;  %v1135_v9 = vld [vmem:[#allocation4 + $0x8] sm:$0xff] }
 0x2a1   : > { %v875_v12 = vpop.f32.mrf.mxu0 }
 0x2a2   : > { %1696 = vpow2.f32 %v890_v10  ;;  %v887_v13 = vmul.f32 0.5, %v872_v11  ;;  %v876_v14 = vadd.f32 %v875_v12, %v790_v0  ;;  %v1134_v10 = vld [vmem:[#allocation4] sm:$0xff] }
 0x2a3   : > { %v877_v15 = vpop.f32.mrf.mxu0  ;;  %v1369_v11 = vld [vmem:[%s2221_s11] ss:$0 sm:$0xff] }
 0x2a4   : > { %v892_v16 = vmul.f32 1.442695, %v887_v13  ;;  %1252 = vst [vmem:[%s2175_s30 + $0x50] sm:$0xff] %v876_v14  ;;  %v878_v17 = vadd.f32 %v877_v15, %v794_v1 }
 0x2a5   : > { %v881_v18 = vpop.f32.mrf.mxu0 }
 0x2a6   : > { %1698 = vpow2.f32 %v892_v16  ;;  %v888_v19 = vmul.f32 0.5, %v878_v17  ;;  %v882_v20 = vadd.f32 %v881_v18, %v790_v0 }
 0x2a7   : > { %v883_v21 = vpop.f32.mrf.mxu0 }
 0x2a8   : > { %v894_v22 = vmul.f32 1.442695, %v888_v19  ;;  %1253 = vst [vmem:[%s2175_s30 + $0x70] sm:$0xff] %v882_v20  ;;  %v884_v23 = vadd.f32 %v883_v21, %v794_v1 }
 0x2aa   : > { %1700 = vpow2.f32 %v894_v22  ;;  %v889_v24 = vmul.f32 0.5, %v884_v23 }
 0x2ac   : > { %v896_v25 = vmul.f32 1.442695, %v889_v24 }
 0x2ae   : > { %1702 = vpow2.f32 %v896_v25  ;;  %v1370_v25 = vld [vmem:[%s2223_s13] ss:$0 sm:$0xff] }
 0x2af   : > { %v1697_v27 = vpop.eup %1696 }
 0x2b0   : > { %1254 = vst [vmem:[%s2175_s30 + $0x18] sm:$0xff] %v1697_v27  ;;  %v902_v28 = vmul.f32 %v1697_v27, %v898_v26 }
 0x2b2   : > { %v906_v30 = vadd.f32 %v902_v28, %v864_v3 }
 0x2b3   : > { %v1699_v31 = vpop.eup %1698 }
 0x2b4   : > { %1255 = vst [vmem:[%s2175_s30 + $0x38] sm:$0xff] %v1699_v31  ;;  %1582 = vmatprep.mubr.f32.mxu1 %v906_v30  ;;  %1246 = vst [vmem:[%s2175_s30 + $0x8] sm:$0xff] %v906_v30  ;;  %v903_v32 = vmul.f32 %v1699_v31, %v899_v29 }
 0x2b6   : > { %v907_v34 = vadd.f32 %v903_v32, %v870_v8  ;;  %v1136_v8 = vld [vmem:[#allocation4 + $0x10] sm:$0xff] }
 0x2b7   : > { %v1701_v35 = vpop.eup %1700 }
 0x2b8   : > { %1256 = vst [vmem:[%s2175_s30 + $0x58] sm:$0xff] %v1701_v35  ;;  %1583 = vmatmul.mubr.f32.vlgmr.msra.gmra.mxu1 %v907_v34  ;;  %1247 = vst [vmem:[%s2175_s30 + $0x28] sm:$0xff] %v907_v34  ;;  %v904_v36 = vmul.f32 %v1701_v35, %v900_v33 }
 0x2b9   : > { %1627 = vmatpush3.msra.mxu1 %v1149_v46 }
 0x2ba   : > { %v908_v38 = vadd.f32 %v904_v36, %v876_v14  ;;  %1628 = vmatprep.subr.mxu1 %v1148_v47 }
 0x2bb   : > { %v1703_v39 = vpop.eup %1702  ;;  %1629 = vmatpush3.msra.mxu1 %v1148_v47 }
 0x2bc   : > { %1257 = vst [vmem:[%s2175_s30 + $0x78] sm:$0xff] %v1703_v39  ;;  %1585 = vmatprep.mubr.f32.mxu1 %v908_v38  ;;  %1248 = vst [vmem:[%s2175_s30 + $0x48] sm:$0xff] %v908_v38  ;;  %v905_v40 = vmul.f32 %v1703_v39, %v901_v37  ;;  %1630 = vmatprep.subr.mxu1 %v1147_v48 }
 0x2bd   : > { %1631 = vmatpush3.msra.mxu1 %v1147_v48 }
 0x2be   : > { %v909_v41 = vadd.f32 %v905_v40, %v882_v20  ;;  %1632 = vmatprep.subr.mxu1 %v1146_v49 }
 0x2bf   : > { %1633 = vmatpush3.msra.mxu1 %v1146_v49 }
 0x2c0   : > { %1586 = vmatmul.mubr.f32.gmra.mxu1 %v909_v41  ;;  %1249 = vst [vmem:[%s2175_s30 + $0x68] sm:$0xff] %v909_v41  ;;  %1634 = vmatprep.subr.mxu1 %v1145_v50 }
 0x2c1   : > { %1635 = vmatpush3.msra.mxu1 %v1145_v50 }
 0x2c2   : > { %1636 = vmatprep.subr.mxu1 %v1144_v51 }
 0x2c3   : > { %1637 = vmatpush3.msra.mxu1 %v1144_v51 }
 0x2c4   : > { %1638 = vmatprep.subr.mxu1 %v1143_v52 }
 0x2c5   : > { %1639 = vmatpush3.msra.mxu1 %v1143_v52 }
 0x2c6   : > { %1640 = vmatprep.subr.mxu1 %v1142_v53 }
 0x2c7   : > { %1641 = vmatpush3.msra.mxu1 %v1142_v53 }
 0x2c8   : > { %1642 = vmatprep.subr.mxu1 %v1141_v54 }
 0x2c9   : > { %1643 = vmatpush3.msra.mxu1 %v1141_v54 }
 0x2ca   : > { %1644 = vmatprep.subr.mxu1 %v1140_v55 }
 0x2cb   : > { %1645 = vmatpush3.msra.mxu1 %v1140_v55 }
 0x2cc   : > { %1646 = vmatprep.subr.mxu1 %v1139_v56 }
 0x2cd   : > { %1647 = vmatpush3.msra.mxu1 %v1139_v56 }
 0x2ce   : > { %1648 = vmatprep.subr.mxu1 %v1138_v57 }
 0x2cf   : > { %1649 = vmatpush3.msra.mxu1 %v1138_v57 }
 0x2d0   : > { %1650 = vmatprep.subr.mxu1 %v1137_v7 }
 0x2d1   : > { %1651 = vmatpush3.msra.mxu1 %v1137_v7 }
 0x2d2   : > { %1652 = vmatprep.subr.mxu1 %v1136_v8 }
 0x2d3   : > { %1653 = vmatpush3.msra.mxu1 %v1136_v8 }
 0x2d4   : > { %1654 = vmatprep.subr.mxu1 %v1135_v9 }
 0x2d5   : > { %1655 = vmatpush3.msra.mxu1 %v1135_v9 }
 0x2d6   : > { %1656 = vmatprep.subr.mxu1 %v1134_v10 }
 0x2d7   : > { %1657 = vmatpush3.msra.mxu1 %v1134_v10 }
 0x378   : > { %v1584_v59 = vpop.f32.mrf.mxu1 }
 0x379   : > { %v1005_v60 = vadd.f32 %v1584_v59, %v1368_v58 }
 0x37a   : > { %v999_v61 = vpop.f32.mrf.mxu1 }
 0x37b   : > { %v1000_v62 = vadd.f32 %v1368_v58, %v999_v61  ;;  %v1019_v0 = vmax.f32 %v1005_v60, 0.0 }
 0x37d   : > { %v1018_v63 = vmax.f32 %v1000_v62, 0.0 }
 0x37f   : > { %1620 = vmatprep.mubr.f32.mxu0 %v1018_v63 }
 0x380   : > { %v1587_v1 = vpop.f32.mrf.mxu1  ;;  %1621 = vmatmul.mubr.f32.vlgmr.msra.gmra.mxu0 %v1019_v0 }
 0x381   : > { %v1015_v2 = vadd.f32 %v1587_v1, %v1368_v58 }
 0x382   : > { %v1009_v3 = vpop.f32.mrf.mxu1 }
 0x383   : > { %v1010_v4 = vadd.f32 %v1368_v58, %v1009_v3  ;;  %v1021_v6 = vmax.f32 %v1015_v2, 0.0 }
 0x385   : > { %v1020_v5 = vmax.f32 %v1010_v4, 0.0 }
 0x387   : > { %1623 = vmatprep.mubr.f32.mxu0 %v1020_v5 }
 0x388   : > { %1624 = vmatmul.mubr.f32.gmra.mxu0 %v1021_v6 }
 0x440   : > { %v1622_v12 = vpop.f32.mrf.mxu0 }
 0x441   : > { %v1117_v13 = vadd.f32 %v1622_v12, %v1369_v11 }
 0x442   : > { %v1111_v14 = vpop.f32.mrf.mxu0 }
 0x443   : > { %v1112_v15 = vadd.f32 %v1369_v11, %v1111_v14  ;;  %v1131_v17 = vmax.f32 %v1117_v13, 0.0 }
 0x445   : > { %v1130_v16 = vmax.f32 %v1112_v15, 0.0 }
 0x447   : > { %1658 = vmatprep.mubr.f32.mxu1 %v1130_v16 }
 0x448   : > { %v1625_v18 = vpop.f32.mrf.mxu0  ;;  %1659 = vmatmul.mubr.f32.vlgmr.msra.gmra.mxu1 %v1131_v17 }
 0x449   : > { %v1127_v19 = vadd.f32 %v1625_v18, %v1369_v11 }
 0x44a   : > { %v1121_v20 = vpop.f32.mrf.mxu0 }
 0x44b   : > { %v1122_v21 = vadd.f32 %v1369_v11, %v1121_v20  ;;  %v1133_v23 = vmax.f32 %v1127_v19, 0.0 }
 0x44d   : > { %v1132_v22 = vmax.f32 %v1122_v21, 0.0 }
 0x44f   : > { %1661 = vmatprep.mubr.f32.mxu1 %v1132_v22 }
 0x450   : > { %1662 = vmatmul.mubr.f32.gmra.mxu1 %v1133_v23 }
 0x508   : > { %v1660_v24 = vpop.f32.mrf.mxu1 }
 0x509   : > { %v1229_v28 = vadd.f32 %v1660_v24, %v1370_v25 }
 0x50a   : > { %v1223_v26 = vpop.f32.mrf.mxu1 }
 0x50b   : > { %v1224_v27 = vadd.f32 %v1370_v25, %v1223_v26  ;;  %1243 = vst [vmem:[%s2175_s30 + $0x20] sm:$0xff] %v1229_v28 }
 0x50d   : > { %1242 = vst [vmem:[%s2175_s30] sm:$0xff] %v1224_v27 }
 0x510   : > { %v1663_v29 = vpop.f32.mrf.mxu1 }
 0x511   : > { %v1239_v32 = vadd.f32 %v1663_v29, %v1370_v25 }
 0x512   : > { %v1233_v30 = vpop.f32.mrf.mxu1 }
 0x513   : > { %v1234_v31 = vadd.f32 %v1370_v25, %v1233_v30  ;;  %1245 = vst [vmem:[%s2175_s30 + $0x60] sm:$0xff] %v1239_v32 }
 0x515   : > { %1244 = vst [vmem:[%s2175_s30 + $0x40] sm:$0xff] %v1234_v31 }
 0x516 PF: > { %s26_s29 = sadd.s32 1, %s1770_s29  }
 0x517   : > { %p23_p2 = scmp.ge.s32.totalorder %s26_s29, 4  }
 0x519   :  { %25 = sbr.rel (!%p23_p2) target bundleno = 2 (0x2), region = 118 }
 0x51e   :  { %1282 = vsyncpa [#allocation3], 1 }
 0x51f   :  { %1284 = vsyncpa [#allocation3 + $0x1], 1 }
 0x520   :  { %1285 = vsyncpa [#allocation5], 1 }

</bundles_post_ra>
